<compile_context>
chip_gen: v5e
topology: v5e:2x2
jax: 0.10.0
libtpu: 0.0.40
codegen_flags: <defaults>
</compile_context>

<pallas_src>
import functools
import math

import jax
import jax.numpy as jnp
from jax import lax
from jax.experimental import pallas as pl
from jax.experimental.pallas import tpu as pltpu


# --------------------------------------------------------------------------
# pltpu.roll direction probe (one tiny kernel, cached for the process)
# --------------------------------------------------------------------------
@functools.lru_cache(maxsize=None)
def _roll_matches_jnp():
  """True iff pltpu.roll(x, s, axis) follows jnp.roll semantics here."""
  def probe(x_ref, o_ref):
    o_ref[...] = pltpu.roll(x_ref[...], 1, 1)

  x = jnp.arange(8 * 128, dtype=jnp.float32).reshape(8, 128)
  out = jax.device_get(
      pl.pallas_call(probe,
                     out_shape=jax.ShapeDtypeStruct((8, 128), jnp.float32))(x))
  if (out == jax.device_get(jnp.roll(x, 1, axis=1))).all():
    return True
  if (out == jax.device_get(jnp.roll(x, -1, axis=1))).all():
    return False
  raise RuntimeError("could not determine pltpu.roll semantics")


# --------------------------------------------------------------------------
# kernel
# --------------------------------------------------------------------------
def _inverted_residual_kernel(*refs, shifts, identity, has_expand, use_mxu,
                              downsample):
  """One grid step processes block_n images, one image at a time.

  Ref order: x, [w1, b1], mwdw, b2, w2, b3, [sel], o
    x    : (block_n, Cin, HW)
    w1   : (Cin, Chid, 1) [VPU path]  or (Chid, Cin) [MXU path]   (BN1 folded)
    b1   : (Chid, 1)
    mwdw : (9, Chid, HW)   depthwise weights * border mask (BN2 folded)
    b2   : (Chid, 1)
    w2   : (Chid, Cout, 1) [VPU path] or (Cout, Chid) [MXU path]  (BN3 folded)
    b3   : (Cout, 1)
    sel  : (HW, HWs)       0/1 even-position selector (stride=2 only)
    o    : (block_n, Cout, HWo)
  """
  it = iter(refs)
  x_ref = next(it)
  w1_ref = next(it) if has_expand else None
  b1_ref = next(it) if has_expand else None
  mwdw_ref = next(it)
  b2_ref = next(it)
  w2_ref = next(it)
  b3_ref = next(it)
  sel_ref = next(it) if downsample else None
  o_ref = next(it)

  block_n, cin, _ = x_ref.shape
  chid = mwdw_ref.shape[1]

  for b in range(block_n):                      # per-image: small live set
    xb = x_ref[b].astype(jnp.float32)           # (Cin, HW)

    # ---- 1x1 expand + BN1 + ReLU6 ----
    if has_expand:
      if use_mxu:
        hb = jnp.dot(w1_ref[...], xb, preferred_element_type=jnp.float32)
      else:
        hb = w1_ref[0] * xb[0:1, :]             # init from first term
        for c in range(1, cin):
          hb = hb + w1_ref[c] * xb[c:c + 1, :]
      hb = jnp.clip(hb + b1_ref[...], 0.0, 6.0)
    else:
      hb = xb                                   # Chid == Cin

    # ---- depthwise 3x3 (stride-1; borders handled by mask-folded weights) --
    acc = None
    for k in range(9):
      s = shifts[k]
      win = hb if s == 0 else pltpu.roll(hb, s, 1)     # win[p] = h[(p+off)%HW]
      term = win * mwdw_ref[k]
      acc = term if acc is None else acc + term
    acc = jnp.clip(acc + b2_ref[...], 0.0, 6.0)

    # ---- stride-2: spatial downsample BEFORE the project (MXU selection) ---
    if downsample:
      acc = jnp.dot(acc, sel_ref[...], preferred_element_type=jnp.float32)

    # ---- 1x1 project + BN3 ----
    if use_mxu:
      yb = jnp.dot(w2_ref[...], acc, preferred_element_type=jnp.float32)
    else:
      yb = w2_ref[0] * acc[0:1, :]
      for d in range(1, chid):
        yb = yb + w2_ref[d] * acc[d:d + 1, :]
    yb = yb + b3_ref[...]

    if identity:
      yb = yb + xb

    o_ref[b] = yb.astype(o_ref.dtype)


# ----------------------------- wrapper helpers -----------------------------
def _make_tap_masks(H, W):
  """(9, 1, H*W) {0,1}: validity of tap (di,dj) at each output pixel."""
  rows = jnp.arange(H)[:, None]
  cols = jnp.arange(W)[None, :]
  masks = []
  for di in range(3):
    for dj in range(3):
      valid = ((rows + di - 1 >= 0) & (rows + di - 1 < H) &
               (cols + dj - 1 >= 0) & (cols + dj - 1 < W))
      masks.append(valid.reshape(1, H * W))
  return jnp.stack(masks, axis=0).astype(jnp.float32)


def _make_stride2_selector(H, W):
  """(H*W, Ho*Wo) 0/1 matrix selecting even (h, w) positions."""
  Ho, Wo = (H - 1) // 2 + 1, (W - 1) // 2 + 1
  q = jnp.arange(Ho * Wo)
  src = (2 * (q // Wo)) * W + 2 * (q % Wo)
  return jnp.zeros((H * W, Ho * Wo), jnp.float32).at[src, q].set(1.0)


def _fold_params(params, expand_ratio, use_mxu, masks):
  """Fold BN scales into conv weights; pick VPU or MXU weight layouts."""
  w1, s1, b1, wdw, s2, b2, w2, s3, b3 = params
  chid = wdw.shape[-1]
  cout = w2.shape[-1]
  f = {}
  if expand_ratio != 1:
    w1f = w1 * s1[None, :]                              # (Cin, Chid)
    f["w1"] = w1f.T if use_mxu else w1f[:, :, None]
    f["b1"] = b1.reshape(chid, 1)
  wdwf = (wdw * s2[None, None, :]).reshape(9, chid, 1)  # BN2 folded
  f["mwdw"] = wdwf * masks                              # (9, Chid, HW)
  f["b2"] = b2.reshape(chid, 1)
  w2f = w2 * s3[None, :]                                # (Chid, Cout)
  f["w2"] = w2f.T if use_mxu else w2f[:, :, None]
  f["b3"] = b3.reshape(cout, 1)
  return f


def _pick_block_n(N, per_image_bytes, *, min_steps=4, block_budget=8 << 20,
                  max_block=16):
  """Images per grid step: keep >= min_steps steps, bound VMEM block size."""
  cap_vmem = max(1, block_budget // max(1, per_image_bytes))
  cap_grid = max(1, N // min_steps) if N >= min_steps else 1
  return int(max(1, min(cap_vmem, cap_grid, max_block)))


def inverted_residual(x_nchw, params, *, stride, expand_ratio, block_n=None):
  """PyTorch-facing forward: NCHW in, NCHW out (eval-mode BatchNorm)."""
  assert stride in (1, 2)
  N, Cin, H, W = x_nchw.shape
  _, _, _, wdw, _, _, w2, _, _ = params
  Chid = wdw.shape[-1]
  Cout = w2.shape[-1]
  has_expand = expand_ratio != 1
  identity = (stride == 1 and Cin == Cout)
  downsample = (stride == 2)
  use_mxu = Chid >= 64          # hopenet widths stay on the VPU broadcast-FMA
  HW = H * W
  if downsample:
    Ho, Wo = (H - 1) // 2 + 1, (W - 1) // 2 + 1
  else:
    Ho, Wo = H, W
  HWo = Ho * Wo

  # Roll shifts implementing win[p] = h[(p + off) % HW]; circular wrap and
  # image borders are zeroed by the mask folded into mwdw.
  like_jnp = _roll_matches_jnp()
  shifts = []
  for di in range(3):
    for dj in range(3):
      off = (di - 1) * W + (dj - 1)
      shifts.append(((-off) % HW) if like_jnp else (off % HW))
  shifts = tuple(shifts)

  masks = _make_tap_masks(H, W)
  f = _fold_params(params, expand_ratio, use_mxu, masks)

  # Block policy + batch padding (no divisibility assert).
  per_image_bytes = 2 * 4 * (Cin * HW + Cout * HWo)   # double-buffered x + out
  if block_n is None:
    block_n = _pick_block_n(N, per_image_bytes)
  n_blocks = pl.cdiv(N, block_n)
  N_pad = n_blocks * block_n

  x_flat = x_nchw.reshape(N, Cin, HW)                 # NCHW is lane-contiguous
  if N_pad != N:
    x_flat = jnp.concatenate(
        [x_flat, jnp.zeros((N_pad - N, Cin, HW), x_flat.dtype)], axis=0)

  const = lambda a: pl.BlockSpec(a.shape, lambda n: (0,) * a.ndim)

  operands = [x_flat]
  in_specs = [pl.BlockSpec((block_n, Cin, HW), lambda n: (n, 0, 0))]
  if has_expand:
    operands += [f["w1"], f["b1"]]
    in_specs += [const(f["w1"]), const(f["b1"])]
  operands += [f["mwdw"], f["b2"], f["w2"], f["b3"]]
  in_specs += [const(f["mwdw"]), const(f["b2"]), const(f["w2"]), const(f["b3"])]
  if downsample:
    sel = _make_stride2_selector(H, W)
    operands.append(sel)
    in_specs.append(const(sel))

  kernel = functools.partial(
      _inverted_residual_kernel, shifts=shifts, identity=identity,
      has_expand=has_expand, use_mxu=use_mxu, downsample=downsample)

  const_bytes = 4 * sum(int(v.size) for v in f.values())
  if downsample:
    const_bytes += 4 * HW * HWo
  vmem_est = block_n * per_image_bytes + 2 * const_bytes
  # Explicit VMEM budget: fits v7x's 64 MiB physical with headroom, also
  # raises v5e's 16 MiB default when blocks grow.
  vmem_limit = int(min(max(2 * vmem_est, 32 << 20), 40 << 20))

  flops_per_img = 2 * 9 * Chid * HW + 2 * Chid * Cout * HWo
  if has_expand:
    flops_per_img += 2 * Cin * Chid * HW
  if downsample:
    flops_per_img += 2 * Chid * HW * HWo
  bytes_accessed = 4 * N_pad * (Cin * HW + Cout * HWo) + const_bytes

  y_flat = pl.pallas_call(
      kernel,
      out_shape=jax.ShapeDtypeStruct((N_pad, Cout, HWo), x_nchw.dtype),
      grid_spec=pltpu.PrefetchScalarGridSpec(
          num_scalar_prefetch=0,
          grid=(n_blocks,),
          in_specs=in_specs,
          out_specs=pl.BlockSpec((block_n, Cout, HWo), lambda n: (n, 0, 0)),
      ),
      compiler_params=pltpu.CompilerParams(
          dimension_semantics=("parallel",),
          vmem_limit_bytes=vmem_limit),
      cost_estimate=pl.CostEstimate(
          flops=int(N_pad * flops_per_img), transcendentals=0,
          bytes_accessed=int(bytes_accessed)),
  )(*operands)

  return y_flat[:N].reshape(N, Cout, Ho, Wo)


# --------------------------- parameter construction -------------------------
def make_params(key, inp, oup, expand_ratio, eps=1e-5):
  hidden = int(round(inp * expand_ratio))
  ks = jax.random.split(key, 15)

  def bn(k0, k1, k2, k3, c):
    gamma = jax.random.uniform(k0, (c,), jnp.float32, 0.5, 1.5)
    beta = 0.1 * jax.random.normal(k1, (c,), jnp.float32)
    mean = 0.1 * jax.random.normal(k2, (c,), jnp.float32)
    var = jax.random.uniform(k3, (c,), jnp.float32, 0.5, 1.5)
    scale = gamma / jnp.sqrt(var + eps)
    return scale, beta - mean * scale

  if expand_ratio != 1:
    w1 = jax.random.normal(ks[0], (inp, hidden), jnp.float32) / math.sqrt(inp)
    s1, b1 = bn(ks[1], ks[2], ks[3], ks[4], hidden)
  else:
    assert hidden == inp
    w1, s1, b1 = None, None, None
  wdw = jax.random.normal(ks[5], (3, 3, hidden), jnp.float32) / 3.0
  s2, b2 = bn(ks[6], ks[7], ks[8], ks[9], hidden)
  w2 = jax.random.normal(ks[10], (hidden, oup), jnp.float32) / math.sqrt(hidden)
  s3, b3 = bn(ks[11], ks[12], ks[13], ks[14], oup)
  return (w1, s1, b1, wdw, s2, b2, w2, s3, b3)


# ----------------------------- pure-JAX reference ---------------------------
def ref_forward_nchw(x_nchw, params, *, stride, expand_ratio):
  w1, s1, b1, wdw, s2, b2, w2, s3, b3 = params
  Chid = wdw.shape[-1]
  N, Cin, H, W = x_nchw.shape
  Cout = w2.shape[-1]
  identity = (stride == 1 and Cin == Cout)
  hi = lax.Precision.HIGHEST
  x = jnp.transpose(x_nchw, (0, 2, 3, 1))                  # NHWC
  if expand_ratio != 1:
    h = jnp.clip(jnp.einsum("nhwc,cd->nhwd", x, w1, precision=hi) * s1 + b1,
                 0.0, 6.0)
  else:
    h = x
  dw = lax.conv_general_dilated(
      h, wdw.reshape(3, 3, 1, Chid), window_strides=(stride, stride),
      padding=((1, 1), (1, 1)), dimension_numbers=("NHWC", "HWIO", "NHWC"),
      feature_group_count=Chid, precision=hi)
  dw = jnp.clip(dw * s2 + b2, 0.0, 6.0)
  y = jnp.einsum("nhwc,cd->nhwd", dw, w2, precision=hi) * s3 + b3
  if identity:
    y = x + y
  return jnp.transpose(y, (0, 3, 1, 2))                    # NCHW


if __name__ == "__main__":
  base_key = jax.random.PRNGKey(0)

  def run_case(case_id, *, inp, oup, stride, expand_ratio, N=2, H=16, W=16,
               rtol=2e-3, atol=2e-3):
    kx, kp = jax.random.split(jax.random.fold_in(base_key, case_id))
    x = jax.random.normal(kx, (N, inp, H, W), jnp.float32)
    params = make_params(kp, inp, oup, expand_ratio)
    out = inverted_residual(x, params, stride=stride,
                            expand_ratio=expand_ratio)
    out = jax.block_until_ready(out)
    ref = ref_forward_nchw(x, params, stride=stride,
                           expand_ratio=expand_ratio)
    assert out.shape == ref.shape, (out.shape, ref.shape)
    err = float(jnp.max(jnp.abs(out - ref)))
    assert jnp.allclose(out, ref, rtol=rtol, atol=atol), (
        f"mismatch vs reference in case {case_id}: max abs err {err}")

  # InvertedResidual(4, 4, stride=1, expand=6): hidden=24, identity active.
  run_case(0, inp=4, oup=4, stride=1, expand_ratio=6)
  # stride=2 branch: in-kernel downsample before the project (MXU selector).
  run_case(1, inp=4, oup=8, stride=2, expand_ratio=6, rtol=2e-2, atol=2e-2)
  # expand_ratio=1 branch (no 1x1 expand), identity active.
  run_case(2, inp=8, oup=8, stride=1, expand_ratio=1)
  # hidden=96 -> 1x1 convs gated onto the MXU (looser tol: MXU f32 rounding).
  run_case(3, inp=16, oup=16, stride=1, expand_ratio=6, rtol=2e-2, atol=2e-2)

  print("KERNEL_OK")
</pallas_src>

<mosaic_0001>
module attributes {stable_mosaic.version = 11 : i64} {
  func.func @probe(%arg0: memref<8x128xf32, #tpu.memory_space<vmem>>, %arg1: memref<8x128xf32, #tpu.memory_space<vmem>>) attributes {dimension_semantics = [], scalar_prefetch = 0 : i64, scratch_operands = 0 : i64, tpu.core_type = #tpu.core_type<tc>} {
    %c0 = arith.constant 0 : index
    %c0_0 = arith.constant 0 : index
    %0 = vector.load %arg0[%c0, %c0_0] : memref<8x128xf32, #tpu.memory_space<vmem>>, vector<8x128xf32>
    %c1_i32 = arith.constant 1 : i32
    %1 = tpu.dynamic_rotate %0 by %c1_i32 dim 1 : vector<8x128xf32>, i32 -> vector<8x128xf32>
    %c0_1 = arith.constant 0 : index
    %c0_2 = arith.constant 0 : index
    %2 = vector.load %arg1[%c0_1, %c0_2] : memref<8x128xf32, #tpu.memory_space<vmem>>, vector<8x128xf32>
    tpu.vector_store %arg1[%c0_1, %c0_2], %1 {strides = array<i32>} : memref<8x128xf32, #tpu.memory_space<vmem>>, vector<8x128xf32>,
    return
  }
}

</mosaic_0001>

<bundles_post_ra>
// kernel: tpu_custom_call.1
= control target key start
LH: loop header
LB: loop body
LE: loop exit
PB: predicated region body
PF: predicated region fallthrough
CT: control target
= control target key end

     0   :  { %6 = vsyncpa [#allocation3], 0  ;;  %s118_s0 = inlined_call_operand.hbm [shape: f32[8,128], index: 0, kind: input, shape index: {}]   ;;  %s119_s1 = inlined_call_operand.hbm [shape: f32[8,128], index: 1, kind: output, shape index: {}]  }
   0x1   :  { %7 = vsyncpa [#allocation4], 0  ;;  %s13_s8 = sshll.u32 %s118_s0, 4  ;;  %s99_s9 = smov [#allocation2]   ;;  %s14_s8 = int_to_ptr.hbm [resolvable:$true] %s13_s8 }
   0x2   :  { %s15_s10 = sshll.u32 %s99_s9, 4  ;;  %s16_s10 = int_to_ptr.vmem [resolvable:$true] %s15_s10 }
   0x3   :  { %18 = dma.hbm_to_vmem [thread:$0]  %s14_s8, 128, %s16_s10, [#allocation3]  }
   0x4   :  { %95 = dma.done.wait [#allocation3], 128  }
   0x5   :  { %96 = vsyncadd [#allocation3], 4294967168  ;;  %v23_v0 = vld [vmem:[#allocation2] sm:$0xff]  ;;  %s100_s11 = smov 1   ;;  %s101_s12 = smov [#allocation5]  }
   0x6   :  { %24 = vrot.lane.b32.xlu0 %v23_v0, %s100_s11  ;;  %s32_s13 = sshll.u32 %s101_s12, 4  ;;  %s34_s16 = sshll.u32 %s119_s1, 4  ;;  %s33_s13 = int_to_ptr.vmem [resolvable:$true] %s32_s13  ;;  %s35_s16 = int_to_ptr.hbm [resolvable:$true] %s34_s16 }
  0x78   :  { %v25_v1 = vpop.permute.xlu0 %24 }
  0x79   :  { %26 = vst [vmem:[#allocation5] sm:$0xff] %v25_v1 }
  0x7a   :  { %37 = dma.vmem_to_hbm [thread:$0]  %s33_s13, 128, %s35_s16, [#allocation4]  }
  0x7b   :  { %97 = dma.done.wait [#allocation4], 128  }
  0x7c   :  { %98 = vsyncadd [#allocation4], 4294967168 }
  0x7d   :  { %42 = vsyncpa [#allocation3], 1 }
  0x7e   :  { %43 = vsyncpa [#allocation4], 1 }

</bundles_post_ra>
